<compile_context>
chip_gen: v6e
topology: v6e:2x2x1
jax: 0.10.0
libtpu: 0.0.40
codegen_flags: <defaults>
</compile_context>

<pallas_src>
import functools

import jax
import jax.numpy as jnp
from jax import lax
from jax.experimental import pallas as pl
from jax.experimental.pallas import tpu as pltpu

_SUBLANES = 8
_LANES = 128


def _ce_partial_sum_kernel(logits_ref, labels_ref, out_ref, acc_ref, *,
                           tile_n, n_valid, blocks_per_part):
    """One grid step: add sum over valid rows of (lse - target_logit) to this partition's acc.

    logits_ref : VMEM (tile_n, C)   — row tile of predictions y_hat (native dtype)
    labels_ref : VMEM (tile_n, 1)   — int32 class labels for the tile
    out_ref    : VMEM (8, 128) f32  — this partition's partial-sum tile (written on last step)
    acc_ref    : VMEM (1, 1)  f32   — running CE partial sum for this partition
    """
    p = pl.program_id(0)          # partition axis ("parallel" — one per TensorCore on v7x)
    i = pl.program_id(1)          # row-tile axis within the partition ("arbitrary")

    @pl.when(i == 0)
    def _():
        acc_ref[...] = jnp.zeros_like(acc_ref)

    logits = logits_ref[...]                       # (tile_n, C), native dtype
    labels = labels_ref[...]                       # (tile_n, 1), int32
    tn, c = logits.shape

    # Row validity from the *unclamped* global block index: masks the ragged last block's
    # tail rows and any clamped duplicate block on a short partition (select, not multiply,
    # so NaN/Inf in garbage rows cannot reach the accumulator).
    gblk = p * blocks_per_part + i
    row_ids = gblk * tile_n + lax.broadcasted_iota(jnp.int32, (tn, 1), 0)
    row_valid = row_ids < n_valid

    # Numerically-stable cross entropy; full-tile math in the native dtype (bf16 stays
    # packed through VPU/EUP on v6e/v7x), per-row reductions accumulated in f32.
    row_max = jnp.max(logits, axis=-1, keepdims=True)                           # (tile_n, 1)
    shifted = logits - row_max                                                   # (tile_n, C)
    sum_exp = jnp.sum(jnp.exp(shifted), axis=-1, keepdims=True,
                      dtype=jnp.float32)                                         # (tile_n, 1) f32

    # Target logit via lane-index compare + select (exact: one non-zero per row).
    col_ids = lax.broadcasted_iota(jnp.int32, (tn, c), 1)
    tgt = jnp.sum(jnp.where(col_ids == labels, logits, 0.0),
                  axis=-1, keepdims=True, dtype=jnp.float32)                     # (tile_n, 1) f32

    ce_rows = row_max.astype(jnp.float32) + jnp.log(sum_exp) - tgt               # (tile_n, 1) f32
    acc_ref[...] = acc_ref[...] + jnp.sum(jnp.where(row_valid, ce_rows, 0.0))

    @pl.when(i == pl.num_programs(1) - 1)
    def _():
        # Broadcast this partition's partial sum over its (8, 128) output tile; the
        # wrapper reads element [0, 0] of each partition's tile and finishes the mean.
        out_ref[...] = acc_ref[...] + jnp.zeros(out_ref.shape, jnp.float32)


def combined_internal_losses(y_hat, y, internal_losses, lambdas, *,
                             tile_n=None, num_parts=2):
    """supe = mean cross-entropy(y_hat, y); returns supe + internal_losses * lambdas."""
    n, c = y_hat.shape

    # --- Row-tile sizing: byte-based (~4 MiB per logits buffer; double-buffered -> ~8 MiB),
    #     multiple of 8 sublanes, capped at 4096 rows and at the batch extent.
    if tile_n is None:
        itemsize = jnp.dtype(y_hat.dtype).itemsize
        per_buffer_budget = 4 * 1024 * 1024
        tile_n = (per_buffer_budget // (c * itemsize)) // _SUBLANES * _SUBLANES
        tile_n = int(max(_SUBLANES, min(4096, tile_n)))
    tile_n = int(max(_SUBLANES, (int(tile_n) // _SUBLANES) * _SUBLANES))
    tile_n = min(tile_n, max(_SUBLANES, (n // _SUBLANES) * _SUBLANES))

    # --- Partition the row blocks across NUM_PARTS for v7x's 2 TensorCores (harmless,
    #     near-free on 1-TC v5e/v6e).  No padding of the logits: the ragged last block and
    #     any clamped duplicate blocks are masked inside the kernel.
    n_blocks = pl.cdiv(n, tile_n)
    num_parts = int(max(1, min(int(num_parts), n_blocks)))
    blocks_per_part = pl.cdiv(n_blocks, num_parts)
    last_block = n_blocks - 1

    def row_block_map(p, i):
        # Clamp so trailing duplicate iterations of a short partition stay in-bounds; their
        # rows are excluded in-kernel via the unclamped global row index.
        return (jnp.minimum(p * blocks_per_part + i, last_block), 0)

    labels_2d = y.astype(jnp.int32).reshape(n, 1)

    kernel = functools.partial(_ce_partial_sum_kernel, tile_n=tile_n,
                               n_valid=n, blocks_per_part=blocks_per_part)

    partials = pl.pallas_call(
        kernel,
        out_shape=jax.ShapeDtypeStruct((num_parts * _SUBLANES, _LANES), jnp.float32),
        grid_spec=pltpu.PrefetchScalarGridSpec(
            num_scalar_prefetch=0,
            grid=(num_parts, blocks_per_part),
            in_specs=[
                pl.BlockSpec((tile_n, c), row_block_map),   # logits row tile (native dtype)
                pl.BlockSpec((tile_n, 1), row_block_map),   # labels row tile
            ],
            out_specs=pl.BlockSpec((_SUBLANES, _LANES), lambda p, i: (p, 0)),
            scratch_shapes=[pltpu.VMEM((1, 1), jnp.float32)],   # per-partition CE accumulator
        ),
        compiler_params=pltpu.CompilerParams(
            dimension_semantics=("parallel", "arbitrary"),
            vmem_limit_bytes=32 * 1024 * 1024,
        ),
    )(y_hat, labels_2d)

    # Finish the 'mean' reduction and the `+ internal_losses * lambdas` combine in plain
    # JAX (negligible work; keeps the kernel output a clean per-core partial sum).
    ce_sum = jnp.sum(partials.reshape(num_parts, _SUBLANES, _LANES)[:, 0, 0])
    supe = ce_sum / jnp.float32(n)
    return supe + internal_losses.astype(jnp.float32) * lambdas.astype(jnp.float32)


if __name__ == "__main__":
    key = jax.random.PRNGKey(0)
    k_logits, k_labels, k_w0, k_w1, k_w2 = jax.random.split(key, 5)

    # Supervised-loss inputs: batch=20 (NOT a multiple of the demo tile of 8, so the ragged
    # last block, the in-kernel masking, and the clamped duplicate block on partition 1 are
    # all exercised), classes=32.
    N, C = 20, 32
    y_hat = jax.random.normal(k_logits, (N, C), dtype=jnp.float32)
    y = jax.random.randint(k_labels, (N,), 0, C, dtype=jnp.int32)

    # Simulate 3 modules_with_loss: each "module" has a deterministic weight and its
    # get_internal_loss() returns mean(W**2). (Glue stays in plain JAX; the forward of
    # CombinedInternalLosses only consumes the resulting scalars.)
    w0 = jax.random.normal(k_w0, (4, 4), dtype=jnp.float32)
    w1 = jax.random.normal(k_w1, (4, 4), dtype=jnp.float32)
    w2 = jax.random.normal(k_w2, (4, 4), dtype=jnp.float32)
    internal_losses = jnp.stack([jnp.mean(w0 ** 2), jnp.mean(w1 ** 2), jnp.mean(w2 ** 2)])
    lambdas = jnp.array([0.5, 1.0, 2.0], dtype=jnp.float32)

    # Small explicit tile (8) so the grid is (2, 2): both partitions, multi-step
    # accumulation, ragged masking, and the clamped duplicate block are all hit.
    combined = combined_internal_losses(y_hat, y, internal_losses, lambdas, tile_n=8)
    combined = jax.block_until_ready(combined)

    # Reference check in plain JAX (cross-entropy + weighted internal losses).
    log_probs = jax.nn.log_softmax(y_hat, axis=-1)
    ce_ref = -jnp.mean(log_probs[jnp.arange(N), y])
    ref = ce_ref + internal_losses * lambdas
    assert jnp.allclose(combined, ref, atol=1e-5, rtol=1e-5), (combined, ref)

    # bf16-in-HBM path: the kernel now keeps bf16 through the VPU/EUP passes, so compare
    # against the f32 reference of the bf16-rounded logits at a bf16-arithmetic tolerance.
    y_hat_bf16 = y_hat.astype(jnp.bfloat16)
    combined_bf16 = combined_internal_losses(y_hat_bf16, y, internal_losses, lambdas, tile_n=8)
    combined_bf16 = jax.block_until_ready(combined_bf16)
    log_probs_bf = jax.nn.log_softmax(y_hat_bf16.astype(jnp.float32), axis=-1)
    ce_bf = -jnp.mean(log_probs_bf[jnp.arange(N), y])
    ref_bf = ce_bf + internal_losses * lambdas
    assert jnp.allclose(combined_bf16, ref_bf, atol=5e-2, rtol=1e-2), (combined_bf16, ref_bf)

    # Auto tile-sizing path (byte-budget tile capped to the batch) for coverage.
    combined_auto = combined_internal_losses(y_hat, y, internal_losses, lambdas)
    combined_auto = jax.block_until_ready(combined_auto)
    assert jnp.allclose(combined_auto, ref, atol=1e-5, rtol=1e-5), (combined_auto, ref)

    print("KERNEL_OK")
</pallas_src>

<mosaic_0001>
module attributes {stable_mosaic.version = 11 : i64} {
  func.func @_ce_partial_sum_kernel(%arg0: i32, %arg1: i32, %arg2: memref<8x32xf32, #tpu.memory_space<vmem>>, %arg3: memref<8x1xi32, #tpu.memory_space<vmem>>, %arg4: memref<8x128xf32, #tpu.memory_space<vmem>>, %arg5: memref<1x1xf32, #tpu.memory_space<vmem>>) attributes {dimension_semantics = [#tpu.dimension_semantics<parallel>, #tpu.dimension_semantics<arbitrary>], iteration_bounds = array<i64: 2, 2>, scalar_prefetch = 0 : i64, scratch_operands = 1 : i64, tpu.core_type = #tpu.core_type<tc>, window_params = [{transform_indices = @transform_0, window_bounds = array<i64: 8, 32>}, {transform_indices = @transform_1, window_bounds = array<i64: 8, 1>}, {transform_indices = @transform_2, window_bounds = array<i64: 8, 128>}]} {
    %c0_i32 = arith.constant 0 : i32
    %0 = arith.cmpi eq, %arg1, %c0_i32 : i32
    %1 = arith.extui %0 : i1 to i32
    %c0_i32_0 = arith.constant 0 : i32
    %2 = arith.cmpi ne, %1, %c0_i32_0 : i32
    scf.if %2 {
      %cst_14 = arith.constant 0.000000e+00 : f32
      %43 = vector.broadcast %cst_14 : f32 to vector<1x1xf32>
      %c0_15 = arith.constant 0 : index
      %c0_16 = arith.constant 0 : index
      %44 = vector.load %arg5[%c0_15, %c0_16] : memref<1x1xf32, #tpu.memory_space<vmem>>, vector<1x1xf32>
      tpu.vector_store %arg5[%c0_15, %c0_16], %43 {strides = array<i32>} : memref<1x1xf32, #tpu.memory_space<vmem>>, vector<1x1xf32>,
    } else {
    }
    %c0 = arith.constant 0 : index
    %c0_1 = arith.constant 0 : index
    %3 = vector.load %arg2[%c0, %c0_1] : memref<8x32xf32, #tpu.memory_space<vmem>>, vector<8x32xf32>
    %c0_2 = arith.constant 0 : index
    %c0_3 = arith.constant 0 : index
    %4 = vector.load %arg3[%c0_2, %c0_3] : memref<8x1xi32, #tpu.memory_space<vmem>>, vector<8x1xi32>
    %c2_i32 = arith.constant 2 : i32
    %5 = arith.muli %arg0, %c2_i32 : i32
    %6 = arith.addi %5, %arg1 : i32
    %c8_i32 = arith.constant 8 : i32
    %7 = arith.muli %6, %c8_i32 : i32
    %8 = tpu.iota {dimensions = array<i32: 0>} : vector<8x1xi32>
    %9 = vector.broadcast %7 : i32 to vector<8x1xi32>
    %10 = arith.addi %9, %8 : vector<8x1xi32>
    %c20_i32 = arith.constant 20 : i32
    %11 = vector.broadcast %c20_i32 : i32 to vector<8x1xi32>
    %12 = arith.cmpi slt, %10, %11 : vector<8x1xi32>
    %cst = arith.constant dense<0xFF800000> : vector<8xf32>
    %13 = vector.multi_reduction <maximumf>, %3, %cst [1] : vector<8x32xf32> to vector<8xf32>
    %14 = vector.shape_cast %13 : vector<8xf32> to vector<8x1xf32>
    %15 = vector.broadcast %14 : vector<8x1xf32> to vector<8x32xf32>
    %16 = arith.subf %3, %15 : vector<8x32xf32>
    %17 = math.exp %16 : vector<8x32xf32>
    %cst_4 = arith.constant dense<0.000000e+00> : vector<8xf32>
    %18 = vector.multi_reduction <add>, %17, %cst_4 [1] : vector<8x32xf32> to vector<8xf32>
    %19 = vector.shape_cast %18 : vector<8xf32> to vector<8x1xf32>
    %20 = tpu.iota {dimensions = array<i32: 1>} : vector<8x32xi32>
    %21 = vector.broadcast %4 : vector<8x1xi32> to vector<8x32xi32>
    %22 = arith.cmpi eq, %20, %21 : vector<8x32xi32>
    %cst_5 = arith.constant 0.000000e+00 : f32
    %23 = vector.broadcast %cst_5 : f32 to vector<8x32xf32>
    %24 = arith.select %22, %3, %23 : vector<8x32xi1>, vector<8x32xf32>
    %cst_6 = arith.constant dense<0.000000e+00> : vector<8xf32>
    %25 = vector.multi_reduction <add>, %24, %cst_6 [1] : vector<8x32xf32> to vector<8xf32>
    %26 = vector.shape_cast %25 : vector<8xf32> to vector<8x1xf32>
    %27 = math.log %19 : vector<8x1xf32>
    %28 = arith.addf %14, %27 : vector<8x1xf32>
    %29 = arith.subf %28, %26 : vector<8x1xf32>
    %c0_7 = arith.constant 0 : index
    %c0_8 = arith.constant 0 : index
    %30 = vector.load %arg5[%c0_7, %c0_8] : memref<1x1xf32, #tpu.memory_space<vmem>>, vector<1x1xf32>
    %cst_9 = arith.constant 0.000000e+00 : f32
    %31 = vector.broadcast %cst_9 : f32 to vector<8x1xf32>
    %32 = arith.select %12, %29, %31 : vector<8x1xi1>, vector<8x1xf32>
    %33 = vector.shape_cast %32 : vector<8x1xf32> to vector<1x8x1xf32>
    %cst_10 = arith.constant dense<0.000000e+00> : vector<1xf32>
    %34 = vector.multi_reduction <add>, %33, %cst_10 [1, 2] : vector<1x8x1xf32> to vector<1xf32>
    %35 = vector.shape_cast %34 : vector<1xf32> to vector<1x1x1xf32>
    %36 = vector.extract %35[0, 0, 0] : f32 from vector<1x1x1xf32>
    %37 = vector.broadcast %36 : f32 to vector<1x1xf32>
    %38 = arith.addf %30, %37 : vector<1x1xf32>
    %c0_11 = arith.constant 0 : index
    %c0_12 = arith.constant 0 : index
    %39 = vector.load %arg5[%c0_11, %c0_12] : memref<1x1xf32, #tpu.memory_space<vmem>>, vector<1x1xf32>
    tpu.vector_store %arg5[%c0_11, %c0_12], %38 {strides = array<i32>} : memref<1x1xf32, #tpu.memory_space<vmem>>, vector<1x1xf32>,
    %c1_i32 = arith.constant 1 : i32
    %40 = arith.cmpi eq, %arg1, %c1_i32 : i32
    %41 = arith.extui %40 : i1 to i32
    %c0_i32_13 = arith.constant 0 : i32
    %42 = arith.cmpi ne, %41, %c0_i32_13 : i32
    scf.if %42 {
      %c0_14 = arith.constant 0 : index
      %c0_15 = arith.constant 0 : index
      %43 = vector.load %arg5[%c0_14, %c0_15] : memref<1x1xf32, #tpu.memory_space<vmem>>, vector<1x1xf32>
      %cst_16 = arith.constant 0.000000e+00 : f32
      %44 = vector.broadcast %cst_16 : f32 to vector<8x128xf32>
      %45 = vector.broadcast %43 : vector<1x1xf32> to vector<8x128xf32>
      %46 = arith.addf %45, %44 : vector<8x128xf32>
      %c0_17 = arith.constant 0 : index
      %c0_18 = arith.constant 0 : index
      %47 = vector.load %arg4[%c0_17, %c0_18] : memref<8x128xf32, #tpu.memory_space<vmem>>, vector<8x128xf32>
      tpu.vector_store %arg4[%c0_17, %c0_18], %46 {strides = array<i32>} : memref<8x128xf32, #tpu.memory_space<vmem>>, vector<8x128xf32>,
    } else {
    }
    return
  }
  func.func @transform_0(%arg0: i32, %arg1: i32) -> (i32, i32) {
    %c2_i32 = arith.constant 2 : i32
    %0 = arith.muli %arg0, %c2_i32 : i32
    %1 = arith.addi %0, %arg1 : i32
    %c2_i32_0 = arith.constant 2 : i32
    %2 = arith.minsi %1, %c2_i32_0 : i32
    %c0_i32 = arith.constant 0 : i32
    %c0_i32_1 = arith.constant 0 : i32
    return %2, %c0_i32 : i32, i32
  }
  func.func @transform_1(%arg0: i32, %arg1: i32) -> (i32, i32) {
    %c2_i32 = arith.constant 2 : i32
    %0 = arith.muli %arg0, %c2_i32 : i32
    %1 = arith.addi %0, %arg1 : i32
    %c2_i32_0 = arith.constant 2 : i32
    %2 = arith.minsi %1, %c2_i32_0 : i32
    %c0_i32 = arith.constant 0 : i32
    %c0_i32_1 = arith.constant 0 : i32
    return %2, %c0_i32 : i32, i32
  }
  func.func @transform_2(%arg0: i32, %arg1: i32) -> (i32, i32) {
    %c0_i32 = arith.constant 0 : i32
    %c0_i32_0 = arith.constant 0 : i32
    return %arg0, %c0_i32 : i32, i32
  }
}

</mosaic_0001>

<bundles_post_ra>
// kernel: tpu_custom_call.1
= control target key start
LH: loop header
LB: loop body
LE: loop exit
PB: predicated region body
PF: predicated region fallthrough
CT: control target
= control target key end

     0   :  { %7 = vsyncpa [#allocation4], 0  ;;  %s760_s0 = inlined_call_operand.vmem [shape: f32[20,32], index: 0, kind: input, shape index: {}]   ;;  %s761_s1 = inlined_call_operand.vmem [shape: s32[20,1], index: 1, kind: input, shape index: {}]   ;;  %s762_s2 = inlined_call_operand.hbm [shape: f32[16,128], index: 2, kind: output, shape index: {}]  }
   0x1   :  { %9 = vsyncpa [#allocation4 + $0x1], 0  ;;  %s617_s9 = smov 0   ;;  %s619_s10 = smov 0  }
   0x2   :  { %s621_s11 = smov 0   ;;  %s623_s12 = smov 0  }
   0x3   :  { %s625_s13 = smov 0   ;;  %s627_s14 = smov 0  }
   0x4   :  { %s629_s15 = smov 0   ;;  %s631_s16 = smov 0  }
   0x5 LB: > { %s393_s17 = sadd.s32 4294967295, %s596_s16   ;;  %s394_s18 = sadd.s32 4294967294, %s596_s16   ;;  %s596_s16 = sphi %s631_s16, %s15_s16   ;;  %s592_s15 = sphi %s629_s15, %s771_s15   ;;  %s588_s14 = sphi %s627_s14, %s770_s14   ;;  %s584_s13 = sphi %s625_s13, %s769_s13   ;;  %s580_s12 = sphi %s623_s12, %s768_s12   ;;  %s576_s11 = sphi %s621_s11, %s767_s11   ;;  %s572_s10 = sphi %s619_s10, %s766_s10   ;;  %s568_s9 = sphi %s617_s9, %s765_s9  }
   0x6   : > { %s24_s19 = sadd.s32 1, %s588_s14  ;;  %s27_s20 = sadd.s32 1, %s592_s15 }
   0x7   : > { %p25_p0 = scmp.ge.s32.totalorder %s24_s19, 2  ;;  %p112_p1 = scmp.ne.s32.totalorder %s576_s11, %s572_s10 }
   0x8   : > { %p113_p2 = scmp.eq.s32.totalorder %s393_s17, 3  ;;  %p118_p4 = scmp.ne.s32.totalorder %s572_s10, %s568_s9 }
   0x9   : > { %s773_s19 = smov (%p25_p0, %s24_s19), 0  ;;  %s775_s20 = smov (!%p25_p0, %s27_s20), %s592_s15 }
   0xa   : > { %p666_p3 = por %p113_p2, %p112_p1  ;;  %p29_p5 = scmp.ge.s32.totalorder %s775_s20, 2 }
   0xb   : > { %p119_p6 = scmp.eq.s32.totalorder %s394_s18, 3  ;;  %p401_p7 = scmp.ge.s32.totalorder %s596_s16, 1 }
   0xc   : > { %p167_p8 = scmp.lt.s32.totalorder %s596_s16, 5  ;;  %s777_s20 = smov (%p29_p5, %s775_s20), 0 }
   0xd   : > { %p676_p9 = por %p119_p6, %p118_p4  ;;  %s99_s23 = ssub.s32 %s592_s15, %s777_s20 }
   0xe   : > { %p168_p10 = pnand %p401_p7, %p167_p8  ;;  %s102_s24 = sadd.s32 1, %s576_s11 }
   0xf   : > { %p100_p11 = scmp.eq.s32.totalorder %s99_s23, 0  ;;  %s197_s26 = sand.u32 (!%p168_p10), 1, %s572_s10  }
  0x10   : > { %171 = sbr.rel (%p168_p10) target bundleno = 707 (0x2c3), region = 28  ;;  %s403_s27 = sshll.u32 (!%p168_p10), %s584_s13, 1 }
  0x11   : > { %s684_s25 = scalar_select %p100_p11, %s576_s11, %s102_s24  }
  0x12   : > { %s690_s28 = sshll.u32 (!%p168_p10), %s197_s26, 3  ;;  %s693_s29 = sadd.s32 (!%p168_p10), %s580_s12, %s403_s27 }
  0x13   : > { %p202_p12 = scmp.lt.s32.totalorder (!%p168_p10), %s693_s29, 2  ;;  %s199_s18 = scalar_lea.vmem (!%p168_p10), [#allocation3], %s690_s28 }
  0x14   : > { %p413_p13 = scmp.ne.s32.totalorder (!%p168_p10), %s580_s12, 0 }
  0x15   : > { %s203_s30 = scalar_select %p202_p12, %s693_s29, 2 }
  0x16   : > { %227 = sbr.rel (%p413_p13) target bundleno = 29 (0x1d), region = 32 }
  0x17   : > { %s779_s30 = smov (!%p202_p12, %s203_s30), 2 }
  0x18   : > { %s407_s3 = sshll.u32 %s779_s30, 3 }
  0x19   : > { %s207_s6 = scalar_lea.vmem %s760_s0, %s407_s3  ;;  %s219_s17 = scalar_lea.vmem %s761_s1, %s407_s3 }
  0x1b   : > { %vm228_vm0 = vcmask 0   ;;  %v598_v0 = vmov 0.0  }
  0x1c   : > { %229 = vst.msk [vmem:[#allocation2] sm:$0x1] %vm228_vm0, %v598_v0 }
  0x1d PF: > { %v230_v1 = vld [vmem:[%s207_s6] sm:$0xff]  ;;  %vm240_vm1 = vcmask 261120   ;;  %v599_v3 = vmov 0   ;;  %v235_v8 = vlaneseq  ;;  %s415_s23 = sshll.u32 %s693_s29, 3  ;;  %vm266_vm4 = vcmask 7168   ;;  %p416_p0 = scmp.ne.s32.totalorder %s580_s12, 1 }
  0x1e   : > { %v241_v2 = vsel %vm240_vm1, %v230_v1, -inf  ;;  %498 = vset.pattern.permute.xlu0 %v599_v3  ;;  %v231_v4 = vld [vmem:[%s219_s17] sm:$0xff]  ;;  %v237_v17 = vstv %s415_s23  ;;  %vm279_vm5 = vcmask 0  }
  0x1f   : > { %242 = vmax.xlane.f32.xlu0 %v241_v2  ;;  %v251_v9 = vand.u32 127, %v235_v8  ;;  %v236_v16 = vshrl.u32 %v235_v8, 7 }
  0x21   : > { %v238_v19 = vadd.s32 %v237_v17, %v236_v16 }
  0x23   : > { %vm239_vm3 = vcmp.lt.s32.totalorder %v238_v19, 20  ;;  %v264_v33 = vld [vmem:[#allocation2] sm:$0x1] }
  0x35   : > { %253 = vperm.xlu0 %498, %v231_v4  }
  0xa8   : > { %v243_v5 = vpop.xlane.xlu0 %242 }
  0xa9   : > { %v244_v6 = vsub.f32 %v230_v1, %v243_v5 }
  0xab   : > { %v245_v7 = vmul.f32 1.442695, %v244_v6 }
  0xad   : > { %499 = vpow2.f32 %v245_v7 }
  0xb0   : > { %v254_v10 = vpop.permute.xlu0 %253 }
  0xb1   : > { %vm255_vm2 = vcmp.eq.s32.totalorder %v251_v9, %v254_v10 }
  0xb2   : > { %v256_v12 = vsel %vm255_vm2, %v230_v1, 0.0 }
  0xb3   : > { %v257_v14 = vsel %vm240_vm1, %v256_v12, 0.0 }
  0xba   : > { %v500_v11 = vpop.eup %499 }
  0xbb   : > { %v247_v13 = vsel %vm240_vm1, %v500_v11, 0.0 }
  0xbc   : > { %248 = vadd.xlane.f32.xlu1 %v247_v13 }
  0xc0   : > { %258 = vadd.xlane.f32.xlu1 %v257_v14 }
 0x145   : > { %v249_v15 = vpop.xlane.xlu1 %248 }
 0x146   : > { %501 = vlog2.f32 %v249_v15 }
 0x149   : > { %v259_v21 = vpop.xlane.xlu1 %258 }
 0x153   : > { %v502_v18 = vpop.eup %501 }
 0x154   : > { %v261_v20 = vmul.f32 0.6931472, %v502_v18 }
 0x156   : > { %v262_v22 = vadd.f32 %v261_v20, %v243_v5 }
 0x158   : > { %v263_v23 = vsub.f32 %v262_v22, %v259_v21 }
 0x15a   : > { %v265_v24 = vsel %vm239_vm3, %v263_v23, 0.0 }
 0x15b   : > { %v267_v25 = vsel %vm266_vm4, %v265_v24, 0.0 }
 0x15c   : > { %268 = vadd.xlane.f32.xlu1 %v267_v25 }
 0x1e5   : > { %v269_v26 = vpop.xlane.xlu1 %268 }
 0x1e6   : > { %v270_v27 = vrot.slane %v269_v26, 4 }
 0x1e8   : > { %v271_v28 = vadd.f32 %v270_v27, %v269_v26 }
 0x1ea   : > { %v272_v29 = vrot.slane %v271_v28, 2 }
 0x1ec   : > { %v273_v30 = vadd.f32 %v272_v29, %v271_v28 }
 0x1ee   : > { %v274_v31 = vrot.slane %v273_v30, 1 }
 0x1f0   : > { %v275_v32 = vadd.f32 %v274_v31, %v273_v30 }
 0x1f2   : > { %422 = vpush %v275_v32 }
 0x223   : > { %s423_s24 = spop %422  ;;  %284 = sbr.rel (%p416_p0) target bundleno = 684 (0x2ac), region = 36 }
 0x224   : > { %v277_v34 = vstv %s423_s24 }
 0x225   : > { %v278_v35 = vadd.f32 %v277_v34, %v264_v33 }
 0x227   : > { %280 = vst.msk [vmem:[#allocation2] sm:$0x1] %vm279_vm5, %v278_v35 }
 0x228   : > { %v600_v37 = vmov 0  }
 0x229   : > { %503 = vset.pattern.permute.xlu0 %v600_v37 }
 0x22e   : > { %v417_v36 = vld [vmem:[#allocation2] ss:$0 sm:$0xff] }
 0x22f   : > { %292 = vperm.xlu0 %503, %v417_v36  }
 0x2aa   : > { %v293_v38 = vpop.permute.xlu0 %292 }
 0x2ab   : > { %296 = vst [vmem:[%s199_s18] sm:$0xff] %v293_v38 }
 0x2ac PF: > { %s419_s27 = sshll.u32 %s584_s13, 7  ;;  %s311_s12 = sshll.u32 %s199_s18, 4  ;;  %s312_s12 = int_to_ptr.vmem [resolvable:$true] %s311_s12 }
 0x2ad   : > { %s309_s3 = scalar_lea.hbm %s762_s2, %s419_s27  ;;  %s298_s4 = scalar_lea.sflag [#allocation4], %s197_s26 }
 0x2ae   : > { %s504_s5 = scalar_lea.vmem %s312_s12, 128  ;;  %s601_s6 = smov [#allocation3]  }
 0x2af   : > { %p505_p1 = scmp.ne.s32.totalorder %s312_s12, %s504_s5  ;;  %s508_s7 = sshll.u32 %s601_s6, 4  ;;  %s509_s7 = int_to_ptr.vmem [resolvable:$false] %s508_s7 }
 0x2b0   : > { %s510_s8 = scalar_lea.vmem %s509_s7, 256  ;;  %p511_p5 = scmp.lt.s32.totalorder %s312_s12, %s509_s7 }
 0x2b1   : > { %p506_p2 = pnand %p505_p1, %p666_p3  ;;  %p512_p6 = scmp.lt.s32.totalorder %s510_s8, %s504_s5 }
 0x2b3   : > { %p507_p4 = pneg %p506_p2  ;;  %p513_p7 = por %p512_p6, %p511_p5 }
 0x2b5   : > { %p514_p8 = pnand %p513_p7, %p507_p4 }
 0x2b7   : > { %517 = shalt.err (!%p514_p8)
}
 0x2b8   : > { %s518_s13 = scalar_lea.hbm %s309_s3, 128  ;;  %s522_s17 = scalar_lea.hbm %s762_s2, 256 }
 0x2b9   : > { %p519_p10 = scmp.ne.s32.totalorder %s309_s3, %s518_s13  ;;  %p523_p13 = scmp.lt.s32.totalorder %s309_s3, %s762_s2 }
 0x2ba   : > { %p524_p0 = scmp.lt.s32.totalorder %s522_s17, %s518_s13 }
 0x2bb   : > { %p520_p11 = pnand %p519_p10, %p666_p3 }
 0x2bc   : > { %p525_p1 = por %p524_p0, %p523_p13 }
 0x2bd   : > { %p521_p12 = pneg %p520_p11 }
 0x2bf   : > { %p526_p2 = pnand %p525_p1, %p521_p12 }
 0x2c1   : > { %529 = shalt.err (!%p526_p2)
}
 0x2c2   : > { %424 = dma.vmem_to_hbm [thread:$0]  (%p666_p3), %s312_s12, 128, %s309_s3, %s298_s4  }
 0x2c3 PF: > { %p430_p4 = scmp.ge.s32.totalorder %s596_s16, 2  ;;  %s323_s24 = sand.u32 1, %s568_s9  }
 0x2c4   : > { %s324_s27 = scalar_lea.sflag [#allocation4], %s323_s24 }
 0x2c5   : > { %p427_p5 = pnand %p430_p4, %p676_p9 }
 0x2c7   : > { %p428_p6 = pneg %p427_p5 }
 0x2c9   : > { %563 = dma.done.wait (%p428_p6), %s324_s27, 128  }
 0x2ca   : > { %565 = vsyncadd (%p428_p6), %s324_s27, 4294967168  ;;  %s15_s16 = sadd.s32 1, %s596_s16   ;;  %s765_s9 = smov %s572_s10 }
 0x2cb   : > { %p12_p7 = scmp.ge.s32.totalorder %s15_s16, 6   ;;  %s766_s10 = smov %s576_s11 }
 0x2cc   : > { %s767_s11 = smov %s684_s25  ;;  %s768_s12 = smov %s588_s14 }
 0x2cd   : > { %s769_s13 = smov %s592_s15  ;;  %s770_s14 = smov %s773_s19 }
 0x2ce   : > { %s771_s15 = smov %s777_s20  ;;  %14 = sbr.rel (!%p12_p7) target bundleno = 5 (0x5), region = 74 }
 0x2d3   :  { %329 = vsyncpa [#allocation4], 1 }
 0x2d4   :  { %331 = vsyncpa [#allocation4 + $0x1], 1 }

</bundles_post_ra>
